<compile_context>
chip_gen: v7x
topology: tpu7x:2x2x1
jax: 0.10.0
libtpu: 0.0.40
codegen_flags: <defaults>
</compile_context>

<pallas_src>
import functools

import jax
import jax.numpy as jnp
from jax.experimental import pallas as pl
from jax.experimental.pallas import tpu as pltpu


_DEFAULT_VMEM_BUDGET = 48 << 20     # conservative: v7x has 64 MiB VMEM per TC


def _round_up(n, m):
    return ((n + m - 1) // m) * m


def _apply_activation(y, activation, negative_slope=0.01):
    if activation == 'ReLU':
        return jnp.maximum(y, 0.0)
    if activation == 'LeakyReLU':
        return jnp.where(y >= 0.0, y, negative_slope * y)
    if activation == 'Sigmoid':
        return jax.nn.sigmoid(y)
    if activation == 'Tanh':
        return jnp.tanh(y)
    return y


# ----------------------------------------------------------------------------
# Fused kernel: whole MLP for one batch tile, all weights VMEM-resident.
# ----------------------------------------------------------------------------
def _mlp_fused_kernel(*refs, layer_cfgs, activation, negative_slope):
    """refs = (x_ref, [w_ref, ss_ref] * num_layers, o_ref).

    x_ref: (tb, in_p) bf16 batch tile.
    w_ref: (in_p, out_p) bf16 transposed weight.
    ss_ref: (2, out_p) f32 -- row 0 = scale, row 1 = shift (bias folded in).
    layer_cfgs: tuple of (apply_bn, is_last) per layer (static).
    """
    x_ref = refs[0]
    o_ref = refs[-1]
    p_refs = refs[1:-1]

    y = x_ref[...]                                     # bf16 LHS
    for li, (apply_bn, is_last) in enumerate(layer_cfgs):
        w_ref, ss_ref = p_refs[2 * li], p_refs[2 * li + 1]
        # Native bf16 MXU pass, f32 accumulation.
        acc = jnp.dot(y, w_ref[...], preferred_element_type=jnp.float32)
        if apply_bn:
            acc = acc * ss_ref[0:1, :] + ss_ref[1:2, :]
        else:
            acc = acc + ss_ref[1:2, :]                 # shift == bias
        if is_last:
            o_ref[...] = acc.astype(o_ref.dtype)
        else:
            # Affine/activation math in f32 (v5e VPU has no bf16); cast to bf16
            # only at the matmul boundary.
            acc = _apply_activation(acc, activation, negative_slope)
            y = acc.astype(jnp.bfloat16)
        # NOTE(eval mode): dropout is the identity.


# ----------------------------------------------------------------------------
# Streaming fallback: one tiled pallas_call per layer (weights not resident).
# ----------------------------------------------------------------------------
def _layer_stream_kernel(x_ref, w_ref, ss_ref, o_ref, acc_ref, *,
                         apply_bn, apply_act, activation, negative_slope):
    k = pl.program_id(2)

    @pl.when(k == 0)
    def _():
        acc_ref[...] = jnp.zeros_like(acc_ref)

    acc_ref[...] += jnp.dot(x_ref[...], w_ref[...],
                            preferred_element_type=jnp.float32)

    @pl.when(k == pl.num_programs(2) - 1)
    def _():
        y = acc_ref[...]
        if apply_bn:
            y = y * ss_ref[0:1, :] + ss_ref[1:2, :]
        else:
            y = y + ss_ref[1:2, :]
        if apply_act:
            y = _apply_activation(y, activation, negative_slope)
        o_ref[...] = y.astype(o_ref.dtype)


def _pick_tile(dim):
    for c in (512, 256, 128):
        if dim % c == 0:
            return min(c, dim)
    return dim          # dims are always multiples of 128 by construction


def _mlp_forward_streaming(xp, params, layer_cfgs, activation, negative_slope,
                           tb, out_dtype):
    """Per-layer streamed path (used when the fused kernel would bust VMEM)."""
    # TODO(synk): small layers could remain VMEM-resident/fused; for simplicity
    # every layer is streamed through its own tiled pallas_call here.
    y = xp
    M = y.shape[0]
    for (w_t, ss), (apply_bn, is_last) in zip(params, layer_cfgs):
        K, N = w_t.shape
        tm = min(tb, M)
        tn = _pick_tile(N)
        tk = _pick_tile(K)
        layer_out_dtype = out_dtype if is_last else jnp.bfloat16
        vmem_est = (2 * (tm * tk * 2 + tk * tn * 2 + 8 * tn * 4 + tm * tn * 4)
                    + tm * tn * 4)
        vmem_limit = min(max(int(vmem_est * 1.5) + (2 << 20), 32 << 20),
                         100 << 20)
        y = pl.pallas_call(
            functools.partial(
                _layer_stream_kernel, apply_bn=apply_bn, apply_act=not is_last,
                activation=activation, negative_slope=negative_slope),
            out_shape=jax.ShapeDtypeStruct((M, N), layer_out_dtype),
            grid=(M // tm, N // tn, K // tk),
            in_specs=[
                pl.BlockSpec((tm, tk), lambda i, j, k: (i, k)),
                pl.BlockSpec((tk, tn), lambda i, j, k: (k, j)),
                pl.BlockSpec((2, tn), lambda i, j, k: (0, j)),
            ],
            out_specs=pl.BlockSpec((tm, tn), lambda i, j, k: (i, j)),
            scratch_shapes=[pltpu.VMEM((tm, tn), jnp.float32)],
            compiler_params=pltpu.CompilerParams(
                dimension_semantics=("parallel", "parallel", "arbitrary"),
                vmem_limit_bytes=vmem_limit),
        )(y, w_t, ss)
    return y


# ----------------------------------------------------------------------------
# Host wrapper.
# ----------------------------------------------------------------------------
def _fused_vmem_bytes(params, tb, in_p0, out_pl, single_buffer_weights):
    wbuf = 1 if single_buffer_weights else 2
    total = 0
    for (w, ss) in params:
        total += wbuf * w.size * w.dtype.itemsize
        total += wbuf * _round_up(ss.shape[0], 8) * ss.shape[1] * ss.dtype.itemsize
    total += 2 * tb * in_p0 * 2          # bf16 input tile, double buffered
    total += 2 * tb * out_pl * 4         # output tile, double buffered
    widest = max(w.shape[1] for (w, _) in params)
    total += 2 * tb * widest * (4 + 2)   # in-kernel f32 acc + bf16 activation slabs
    return total


def mlp_forward(x, params, layer_cfgs, activation, output_size, *,
                negative_slope=0.01, tile_b=512,
                vmem_budget_bytes=_DEFAULT_VMEM_BUDGET):
    """Run the MLP. params[i] = (w_t bf16 (in_p,out_p), ss f32 (2,out_p))."""
    B, F = x.shape
    in_p0 = params[0][0].shape[0]
    out_pl = params[-1][0].shape[1]

    # Batch tiling: 16-row multiples (bf16 sublane packing).  Guarantee >= 2
    # tiles when possible so the 'parallel' axis can use both v7x TensorCores.
    b16 = _round_up(max(B, 1), 16)
    tb = min(_round_up(tile_b, 16), b16)
    if b16 >= 32:
        tb = min(tb, _round_up(pl.cdiv(b16, 2), 16))
    b_pad = _round_up(b16, tb)
    n_tiles = b_pad // tb

    # Zero-pad batch rows / feature lanes; cast the LHS to MXU-native bf16.
    xp = jnp.zeros((b_pad, in_p0), jnp.bfloat16).at[:B, :F].set(
        x.astype(jnp.bfloat16))

    # ---- VMEM budget check: stream layer-by-layer if weights don't fit. ----
    if _fused_vmem_bytes(params, tb, in_p0, out_pl, True) > vmem_budget_bytes:
        yp = _mlp_forward_streaming(xp, params, layer_cfgs, activation,
                                    negative_slope, tb, x.dtype)
        return yp[:B, :output_size]

    # ---------------------------- fused path --------------------------------
    flops = 2 * b_pad * sum(w.shape[0] * w.shape[1] for (w, _) in params)
    hidden_out = sum(w.shape[1]
                     for (w, _), (_, last) in zip(params, layer_cfgs) if not last)
    transcendentals = b_pad * hidden_out if activation in ('Sigmoid', 'Tanh') else 0
    bytes_accessed = (xp.size * 2 + b_pad * out_pl * 4 +
                      sum(w.size * 2 + ss.size * 4 for (w, ss) in params))

    def build_call(single_buffer_weights):
        flat_inputs = [xp]
        in_specs = [pl.BlockSpec((tb, in_p0), lambda i: (i, 0))]
        for (w_t, ss) in params:
            flat_inputs += [w_t, ss]
            if single_buffer_weights:
                # Grid-invariant blocks: single-buffer them (halves residency).
                in_specs += [
                    pl.BlockSpec(w_t.shape, lambda i: (0, 0),
                                 pipeline_mode=pl.Buffered(1)),
                    pl.BlockSpec(ss.shape, lambda i: (0, 0),
                                 pipeline_mode=pl.Buffered(1)),
                ]
            else:
                in_specs += [
                    pl.BlockSpec(w_t.shape, lambda i: (0, 0)),
                    pl.BlockSpec(ss.shape, lambda i: (0, 0)),
                ]

        vmem_est = _fused_vmem_bytes(params, tb, in_p0, out_pl,
                                     single_buffer_weights)
        vmem_limit = min(max(int(vmem_est * 1.5) + (2 << 20), 32 << 20),
                         100 << 20)

        kernel = functools.partial(
            _mlp_fused_kernel, layer_cfgs=tuple(layer_cfgs),
            activation=activation, negative_slope=negative_slope)

        return pl.pallas_call(
            kernel,
            out_shape=jax.ShapeDtypeStruct((b_pad, out_pl), x.dtype),
            grid=(n_tiles,),
            in_specs=in_specs,
            out_specs=pl.BlockSpec((tb, out_pl), lambda i: (i, 0)),
            compiler_params=pltpu.CompilerParams(
                dimension_semantics=("parallel",),
                vmem_limit_bytes=vmem_limit),
            cost_estimate=pl.CostEstimate(
                flops=int(flops), transcendentals=int(transcendentals),
                bytes_accessed=int(bytes_accessed)),
        )(*flat_inputs)

    try:
        yp = build_call(single_buffer_weights=True)
    except Exception:
        # pipeline_mode=pl.Buffered(1) not supported on this jax version:
        # fall back to default double-buffered weight blocks.
        yp = build_call(single_buffer_weights=False)

    return yp[:B, :output_size]


# ----------------------------------------------------------------------------
# Module-equivalent wrapper.
# ----------------------------------------------------------------------------
class PallasMLP:
    """JAX/Pallas equivalent of the PyTorch MLP module (inference forward)."""

    def __init__(self, input_size, output_size, hidden_layer_sizes,
                 activation_func, dropout_rate, batch_norm, *, key,
                 negative_slope=0.01):
        self.activation = activation_func
        self.negative_slope = negative_slope
        self.dropout_rate = dropout_rate      # identity in eval mode
        self.batch_norm = batch_norm
        self.output_size = output_size
        sizes = [input_size] + list(hidden_layer_sizes) + [output_size]
        self.sizes = sizes

        eps = 1e-5
        num_layers = len(sizes) - 1
        self.params = []        # lane-padded (w_t bf16, ss f32) per layer
        self.layer_cfgs = []    # (apply_bn, is_last) per layer (static)
        self._raw = []          # unpadded params for the pure-JAX references

        for i in range(num_layers):
            fan_in, fan_out = sizes[i], sizes[i + 1]
            key, kw, kb = jax.random.split(key, 3)
            # deterministic synthetic init (mimics torch uniform(-1/sqrt(fan_in), ...))
            bound = 1.0 / float(fan_in) ** 0.5
            w = jax.random.uniform(kw, (fan_out, fan_in), jnp.float32,
                                   minval=-bound, maxval=bound)
            b = jax.random.uniform(kb, (fan_out,), jnp.float32,
                                   minval=-bound, maxval=bound)
            is_last = (i == num_layers - 1)
            apply_bn = (not is_last) and batch_norm

            if apply_bn:
                # eval-mode BN with freshly-initialized stats:
                # gamma=1, beta=0, running_mean=0, running_var=1
                gamma = jnp.ones((fan_out,), jnp.float32)
                beta = jnp.zeros((fan_out,), jnp.float32)
                r_mean = jnp.zeros((fan_out,), jnp.float32)
                r_var = jnp.ones((fan_out,), jnp.float32)
                scale = gamma * jax.lax.rsqrt(r_var + eps)
                shift = (b - r_mean) * scale + beta     # Linear bias folded in
            else:
                scale = jnp.ones((fan_out,), jnp.float32)
                shift = b

            # Lane-dense padding: feature dims -> multiples of 128.
            # (On v6e/v7x, padding to 256 when fan >= 192 would fully fill the
            #  2x256x256 MXU; kept at 128 for portability.)
            in_p = _round_up(fan_in, 128)
            out_p = _round_up(fan_out, 128)
            w_t = (jnp.zeros((in_p, out_p), jnp.float32)
                   .at[:fan_in, :fan_out].set(w.T)).astype(jnp.bfloat16)
            # Packed affine: row 0 = scale, row 1 = shift (padded lanes: 1 / 0).
            ss = (jnp.zeros((2, out_p), jnp.float32)
                  .at[0, :].set(1.0)
                  .at[0, :fan_out].set(scale)
                  .at[1, :fan_out].set(shift))

            self.params.append((w_t, ss))
            self.layer_cfgs.append((apply_bn, is_last))
            self._raw.append((w.T.astype(jnp.bfloat16), scale, shift,
                              apply_bn, is_last))

    def __call__(self, x, **kwargs):
        return mlp_forward(x, self.params, self.layer_cfgs, self.activation,
                           self.output_size, negative_slope=self.negative_slope,
                           **kwargs)

    def reference(self, x):
        """Pure-JAX forward with matching numerics (bf16 operands, f32 accum)."""
        y = x.astype(jnp.bfloat16)
        for (w_t, scale, shift, apply_bn, is_last) in self._raw:
            acc = jnp.dot(y, w_t, preferred_element_type=jnp.float32)
            acc = acc * scale + shift if apply_bn else acc + shift
            if is_last:
                y = acc
            else:
                acc = _apply_activation(acc, self.activation, self.negative_slope)
                y = acc.astype(jnp.bfloat16)
        return y.astype(x.dtype)

    def reference_f32(self, x):
        """f32 forward (module semantics), loose sanity check of the bf16 path."""
        y = x
        for (w_t, scale, shift, apply_bn, is_last) in self._raw:
            acc = jnp.dot(y, w_t.astype(jnp.float32))
            acc = acc * scale + shift if apply_bn else acc + shift
            if not is_last:
                acc = _apply_activation(acc, self.activation, self.negative_slope)
            y = acc
        return y


if __name__ == "__main__":
    key = jax.random.PRNGKey(0)
    key, k_in, k_model = jax.random.split(key, 3)

    batch = 8
    input_size = 16
    hidden_layer_sizes = [32, 32]
    output_size = 8

    mlp = PallasMLP(input_size, output_size, hidden_layer_sizes,
                    activation_func='ReLU', dropout_rate=0.5, batch_norm=True,
                    key=k_model)

    x = jax.random.normal(k_in, (batch, input_size), jnp.float32)

    # Fused (weights VMEM-resident) path.
    y = mlp(x)
    jax.block_until_ready(y)
    assert y.shape == (batch, output_size)

    y_ref = mlp.reference(x)          # numerics-matched reference (bf16/f32-acc)
    err = float(jnp.max(jnp.abs(y - y_ref)))
    assert jnp.allclose(y, y_ref, rtol=2e-2, atol=2e-2), err

    y_f32 = mlp.reference_f32(x)      # module-semantics sanity check
    err32 = float(jnp.max(jnp.abs(y - y_f32)))
    assert jnp.allclose(y, y_f32, rtol=5e-2, atol=5e-2), err32

    # Exercise the streaming (per-layer, weight-tiled) fallback path too.
    y_stream = mlp(x, vmem_budget_bytes=1)
    jax.block_until_ready(y_stream)
    assert y_stream.shape == (batch, output_size)
    assert jnp.allclose(y_stream, y_ref, rtol=2e-2, atol=2e-2)

    print("KERNEL_OK")
</pallas_src>

<mosaic_0001>
module attributes {stable_mosaic.version = 11 : i64} {
  func.func @_mlp_fused_kernel(%arg0: i32, %arg1: memref<16x128xbf16, #tpu.memory_space<vmem>>, %arg2: memref<128x128xbf16, #tpu.memory_space<vmem>>, %arg3: memref<2x128xf32, #tpu.memory_space<vmem>>, %arg4: memref<128x128xbf16, #tpu.memory_space<vmem>>, %arg5: memref<2x128xf32, #tpu.memory_space<vmem>>, %arg6: memref<128x128xbf16, #tpu.memory_space<vmem>>, %arg7: memref<2x128xf32, #tpu.memory_space<vmem>>, %arg8: memref<16x128xf32, #tpu.memory_space<vmem>>) attributes {dimension_semantics = [#tpu.dimension_semantics<parallel>], iteration_bounds = array<i64: 1>, scalar_prefetch = 0 : i64, scratch_operands = 0 : i64, tpu.core_type = #tpu.core_type<tc>, window_params = [{transform_indices = @transform_0, window_bounds = array<i64: 16, 128>}, {pipeline_mode = #tpu.pipeline_mode<synchronous>, transform_indices = @transform_1, window_bounds = array<i64: 128, 128>}, {pipeline_mode = #tpu.pipeline_mode<synchronous>, transform_indices = @transform_2, window_bounds = array<i64: 2, 128>}, {pipeline_mode = #tpu.pipeline_mode<synchronous>, transform_indices = @transform_3, window_bounds = array<i64: 128, 128>}, {pipeline_mode = #tpu.pipeline_mode<synchronous>, transform_indices = @transform_4, window_bounds = array<i64: 2, 128>}, {pipeline_mode = #tpu.pipeline_mode<synchronous>, transform_indices = @transform_5, window_bounds = array<i64: 128, 128>}, {pipeline_mode = #tpu.pipeline_mode<synchronous>, transform_indices = @transform_6, window_bounds = array<i64: 2, 128>}, {transform_indices = @transform_7, window_bounds = array<i64: 16, 128>}]} {
    %c0 = arith.constant 0 : index
    %c0_0 = arith.constant 0 : index
    %0 = vector.load %arg1[%c0, %c0_0] : memref<16x128xbf16, #tpu.memory_space<vmem>>, vector<16x128xbf16>
    %c0_1 = arith.constant 0 : index
    %c0_2 = arith.constant 0 : index
    %1 = vector.load %arg2[%c0_1, %c0_2] : memref<128x128xbf16, #tpu.memory_space<vmem>>, vector<128x128xbf16>
    %cst = arith.constant dense<0.000000e+00> : vector<16x128xf32>
    %2 = tpu.matmul %0, %1, %cst {dimension_numbers = #tpu.dot_dimension_numbers<[1], [0], [0], [1], [0, 0, 1, 1], [], []>} : vector<16x128xbf16>, vector<128x128xbf16>, vector<16x128xf32> -> vector<16x128xf32>
    %c0_3 = arith.constant 0 : index
    %c0_4 = arith.constant 0 : index
    %3 = vector.load %arg3[%c0_3, %c0_4] : memref<2x128xf32, #tpu.memory_space<vmem>>, vector<1x128xf32>
    %4 = vector.broadcast %3 : vector<1x128xf32> to vector<16x128xf32>
    %5 = arith.mulf %2, %4 : vector<16x128xf32>
    %c1 = arith.constant 1 : index
    %c0_5 = arith.constant 0 : index
    %6 = vector.load %arg3[%c1, %c0_5] : memref<2x128xf32, #tpu.memory_space<vmem>>, vector<1x128xf32>
    %7 = vector.broadcast %6 : vector<1x128xf32> to vector<16x128xf32>
    %8 = arith.addf %5, %7 : vector<16x128xf32>
    %cst_6 = arith.constant 0.000000e+00 : f32
    %9 = vector.broadcast %cst_6 : f32 to vector<16x128xf32>
    %10 = arith.maximumf %8, %9 : vector<16x128xf32>
    %11 = arith.truncf %10 : vector<16x128xf32> to vector<16x128xbf16>
    %c0_7 = arith.constant 0 : index
    %c0_8 = arith.constant 0 : index
    %12 = vector.load %arg4[%c0_7, %c0_8] : memref<128x128xbf16, #tpu.memory_space<vmem>>, vector<128x128xbf16>
    %cst_9 = arith.constant dense<0.000000e+00> : vector<16x128xf32>
    %13 = tpu.matmul %11, %12, %cst_9 {dimension_numbers = #tpu.dot_dimension_numbers<[1], [0], [0], [1], [0, 0, 1, 1], [], []>} : vector<16x128xbf16>, vector<128x128xbf16>, vector<16x128xf32> -> vector<16x128xf32>
    %c0_10 = arith.constant 0 : index
    %c0_11 = arith.constant 0 : index
    %14 = vector.load %arg5[%c0_10, %c0_11] : memref<2x128xf32, #tpu.memory_space<vmem>>, vector<1x128xf32>
    %15 = vector.broadcast %14 : vector<1x128xf32> to vector<16x128xf32>
    %16 = arith.mulf %13, %15 : vector<16x128xf32>
    %c1_12 = arith.constant 1 : index
    %c0_13 = arith.constant 0 : index
    %17 = vector.load %arg5[%c1_12, %c0_13] : memref<2x128xf32, #tpu.memory_space<vmem>>, vector<1x128xf32>
    %18 = vector.broadcast %17 : vector<1x128xf32> to vector<16x128xf32>
    %19 = arith.addf %16, %18 : vector<16x128xf32>
    %cst_14 = arith.constant 0.000000e+00 : f32
    %20 = vector.broadcast %cst_14 : f32 to vector<16x128xf32>
    %21 = arith.maximumf %19, %20 : vector<16x128xf32>
    %22 = arith.truncf %21 : vector<16x128xf32> to vector<16x128xbf16>
    %c0_15 = arith.constant 0 : index
    %c0_16 = arith.constant 0 : index
    %23 = vector.load %arg6[%c0_15, %c0_16] : memref<128x128xbf16, #tpu.memory_space<vmem>>, vector<128x128xbf16>
    %cst_17 = arith.constant dense<0.000000e+00> : vector<16x128xf32>
    %24 = tpu.matmul %22, %23, %cst_17 {dimension_numbers = #tpu.dot_dimension_numbers<[1], [0], [0], [1], [0, 0, 1, 1], [], []>} : vector<16x128xbf16>, vector<128x128xbf16>, vector<16x128xf32> -> vector<16x128xf32>
    %c1_18 = arith.constant 1 : index
    %c0_19 = arith.constant 0 : index
    %25 = vector.load %arg7[%c1_18, %c0_19] : memref<2x128xf32, #tpu.memory_space<vmem>>, vector<1x128xf32>
    %26 = vector.broadcast %25 : vector<1x128xf32> to vector<16x128xf32>
    %27 = arith.addf %24, %26 : vector<16x128xf32>
    %c0_20 = arith.constant 0 : index
    %c0_21 = arith.constant 0 : index
    %28 = vector.load %arg8[%c0_20, %c0_21] : memref<16x128xf32, #tpu.memory_space<vmem>>, vector<16x128xf32>
    tpu.vector_store %arg8[%c0_20, %c0_21], %27 {strides = array<i32>} : memref<16x128xf32, #tpu.memory_space<vmem>>, vector<16x128xf32>,
    return
  }
  func.func @transform_0(%arg0: i32) -> (i32, i32) {
    %c0_i32 = arith.constant 0 : i32
    %c0_i32_0 = arith.constant 0 : i32
    return %arg0, %c0_i32 : i32, i32
  }
  func.func @transform_1(%arg0: i32) -> (i32, i32) {
    %c0_i32 = arith.constant 0 : i32
    %c0_i32_0 = arith.constant 0 : i32
    %c0_i32_1 = arith.constant 0 : i32
    return %c0_i32, %c0_i32_0 : i32, i32
  }
  func.func @transform_2(%arg0: i32) -> (i32, i32) {
    %c0_i32 = arith.constant 0 : i32
    %c0_i32_0 = arith.constant 0 : i32
    %c0_i32_1 = arith.constant 0 : i32
    return %c0_i32, %c0_i32_0 : i32, i32
  }
  func.func @transform_3(%arg0: i32) -> (i32, i32) {
    %c0_i32 = arith.constant 0 : i32
    %c0_i32_0 = arith.constant 0 : i32
    %c0_i32_1 = arith.constant 0 : i32
    return %c0_i32, %c0_i32_0 : i32, i32
  }
  func.func @transform_4(%arg0: i32) -> (i32, i32) {
    %c0_i32 = arith.constant 0 : i32
    %c0_i32_0 = arith.constant 0 : i32
    %c0_i32_1 = arith.constant 0 : i32
    return %c0_i32, %c0_i32_0 : i32, i32
  }
  func.func @transform_5(%arg0: i32) -> (i32, i32) {
    %c0_i32 = arith.constant 0 : i32
    %c0_i32_0 = arith.constant 0 : i32
    %c0_i32_1 = arith.constant 0 : i32
    return %c0_i32, %c0_i32_0 : i32, i32
  }
  func.func @transform_6(%arg0: i32) -> (i32, i32) {
    %c0_i32 = arith.constant 0 : i32
    %c0_i32_0 = arith.constant 0 : i32
    %c0_i32_1 = arith.constant 0 : i32
    return %c0_i32, %c0_i32_0 : i32, i32
  }
  func.func @transform_7(%arg0: i32) -> (i32, i32) {
    %c0_i32 = arith.constant 0 : i32
    %c0_i32_0 = arith.constant 0 : i32
    return %arg0, %c0_i32 : i32, i32
  }
}

module attributes {stable_mosaic.version = 11 : i64} {
  func.func @_mlp_fused_kernel(%arg0: i32, %arg1: memref<16x128xbf16, #tpu.memory_space<vmem>>, %arg2: memref<128x128xbf16, #tpu.memory_space<vmem>>, %arg3: memref<2x128xf32, #tpu.memory_space<vmem>>, %arg4: memref<128x128xbf16, #tpu.memory_space<vmem>>, %arg5: memref<2x128xf32, #tpu.memory_space<vmem>>, %arg6: memref<128x128xbf16, #tpu.memory_space<vmem>>, %arg7: memref<2x128xf32, #tpu.memory_space<vmem>>, %arg8: memref<16x128xf32, #tpu.memory_space<vmem>>) attributes {dimension_semantics = [#tpu.dimension_semantics<parallel>], iteration_bounds = array<i64: 1>, scalar_prefetch = 0 : i64, scratch_operands = 0 : i64, tpu.core_type = #tpu.core_type<tc>, window_params = [{transform_indices = @transform_0, window_bounds = array<i64: 16, 128>}, {pipeline_mode = #tpu.pipeline_mode<synchronous>, transform_indices = @transform_1, window_bounds = array<i64: 128, 128>}, {pipeline_mode = #tpu.pipeline_mode<synchronous>, transform_indices = @transform_2, window_bounds = array<i64: 2, 128>}, {pipeline_mode = #tpu.pipeline_mode<synchronous>, transform_indices = @transform_3, window_bounds = array<i64: 128, 128>}, {pipeline_mode = #tpu.pipeline_mode<synchronous>, transform_indices = @transform_4, window_bounds = array<i64: 2, 128>}, {pipeline_mode = #tpu.pipeline_mode<synchronous>, transform_indices = @transform_5, window_bounds = array<i64: 128, 128>}, {pipeline_mode = #tpu.pipeline_mode<synchronous>, transform_indices = @transform_6, window_bounds = array<i64: 2, 128>}, {transform_indices = @transform_7, window_bounds = array<i64: 16, 128>}]} {
    %c0 = arith.constant 0 : index
    %c0_0 = arith.constant 0 : index
    %0 = vector.load %arg1[%c0, %c0_0] : memref<16x128xbf16, #tpu.memory_space<vmem>>, vector<16x128xbf16>
    %c0_1 = arith.constant 0 : index
    %c0_2 = arith.constant 0 : index
    %1 = vector.load %arg2[%c0_1, %c0_2] : memref<128x128xbf16, #tpu.memory_space<vmem>>, vector<128x128xbf16>
    %cst = arith.constant dense<0.000000e+00> : vector<16x128xf32>
    %2 = tpu.matmul %0, %1, %cst {dimension_numbers = #tpu.dot_dimension_numbers<[1], [0], [0], [1], [0, 0, 1, 1], [], []>} : vector<16x128xbf16>, vector<128x128xbf16>, vector<16x128xf32> -> vector<16x128xf32>
    %c0_3 = arith.constant 0 : index
    %c0_4 = arith.constant 0 : index
    %3 = vector.load %arg3[%c0_3, %c0_4] : memref<2x128xf32, #tpu.memory_space<vmem>>, vector<1x128xf32>
    %4 = vector.broadcast %3 : vector<1x128xf32> to vector<16x128xf32>
    %5 = arith.mulf %2, %4 : vector<16x128xf32>
    %c1 = arith.constant 1 : index
    %c0_5 = arith.constant 0 : index
    %6 = vector.load %arg3[%c1, %c0_5] : memref<2x128xf32, #tpu.memory_space<vmem>>, vector<1x128xf32>
    %7 = vector.broadcast %6 : vector<1x128xf32> to vector<16x128xf32>
    %8 = arith.addf %5, %7 : vector<16x128xf32>
    %cst_6 = arith.constant 0.000000e+00 : f32
    %9 = vector.broadcast %cst_6 : f32 to vector<16x128xf32>
    %10 = arith.maximumf %8, %9 : vector<16x128xf32>
    %11 = arith.truncf %10 : vector<16x128xf32> to vector<16x128xbf16>
    %c0_7 = arith.constant 0 : index
    %c0_8 = arith.constant 0 : index
    %12 = vector.load %arg4[%c0_7, %c0_8] : memref<128x128xbf16, #tpu.memory_space<vmem>>, vector<128x128xbf16>
    %cst_9 = arith.constant dense<0.000000e+00> : vector<16x128xf32>
    %13 = tpu.matmul %11, %12, %cst_9 {dimension_numbers = #tpu.dot_dimension_numbers<[1], [0], [0], [1], [0, 0, 1, 1], [], []>} : vector<16x128xbf16>, vector<128x128xbf16>, vector<16x128xf32> -> vector<16x128xf32>
    %c0_10 = arith.constant 0 : index
    %c0_11 = arith.constant 0 : index
    %14 = vector.load %arg5[%c0_10, %c0_11] : memref<2x128xf32, #tpu.memory_space<vmem>>, vector<1x128xf32>
    %15 = vector.broadcast %14 : vector<1x128xf32> to vector<16x128xf32>
    %16 = arith.mulf %13, %15 : vector<16x128xf32>
    %c1_12 = arith.constant 1 : index
    %c0_13 = arith.constant 0 : index
    %17 = vector.load %arg5[%c1_12, %c0_13] : memref<2x128xf32, #tpu.memory_space<vmem>>, vector<1x128xf32>
    %18 = vector.broadcast %17 : vector<1x128xf32> to vector<16x128xf32>
    %19 = arith.addf %16, %18 : vector<16x128xf32>
    %cst_14 = arith.constant 0.000000e+00 : f32
    %20 = vector.broadcast %cst_14 : f32 to vector<16x128xf32>
    %21 = arith.maximumf %19, %20 : vector<16x128xf32>
    %22 = arith.truncf %21 : vector<16x128xf32> to vector<16x128xbf16>
    %c0_15 = arith.constant 0 : index
    %c0_16 = arith.constant 0 : index
    %23 = vector.load %arg6[%c0_15, %c0_16] : memref<128x128xbf16, #tpu.memory_space<vmem>>, vector<128x128xbf16>
    %cst_17 = arith.constant dense<0.000000e+00> : vector<16x128xf32>
    %24 = tpu.matmul %22, %23, %cst_17 {dimension_numbers = #tpu.dot_dimension_numbers<[1], [0], [0], [1], [0, 0, 1, 1], [], []>} : vector<16x128xbf16>, vector<128x128xbf16>, vector<16x128xf32> -> vector<16x128xf32>
    %c1_18 = arith.constant 1 : index
    %c0_19 = arith.constant 0 : index
    %25 = vector.load %arg7[%c1_18, %c0_19] : memref<2x128xf32, #tpu.memory_space<vmem>>, vector<1x128xf32>
    %26 = vector.broadcast %25 : vector<1x128xf32> to vector<16x128xf32>
    %27 = arith.addf %24, %26 : vector<16x128xf32>
    %c0_20 = arith.constant 0 : index
    %c0_21 = arith.constant 0 : index
    %28 = vector.load %arg8[%c0_20, %c0_21] : memref<16x128xf32, #tpu.memory_space<vmem>>, vector<16x128xf32>
    tpu.vector_store %arg8[%c0_20, %c0_21], %27 {strides = array<i32>} : memref<16x128xf32, #tpu.memory_space<vmem>>, vector<16x128xf32>,
    return
  }
  func.func @transform_0(%arg0: i32) -> (i32, i32) {
    %c0_i32 = arith.constant 0 : i32
    %c0_i32_0 = arith.constant 0 : i32
    return %arg0, %c0_i32 : i32, i32
  }
  func.func @transform_1(%arg0: i32) -> (i32, i32) {
    %c0_i32 = arith.constant 0 : i32
    %c0_i32_0 = arith.constant 0 : i32
    %c0_i32_1 = arith.constant 0 : i32
    return %c0_i32, %c0_i32_0 : i32, i32
  }
  func.func @transform_2(%arg0: i32) -> (i32, i32) {
    %c0_i32 = arith.constant 0 : i32
    %c0_i32_0 = arith.constant 0 : i32
    %c0_i32_1 = arith.constant 0 : i32
    return %c0_i32, %c0_i32_0 : i32, i32
  }
  func.func @transform_3(%arg0: i32) -> (i32, i32) {
    %c0_i32 = arith.constant 0 : i32
    %c0_i32_0 = arith.constant 0 : i32
    %c0_i32_1 = arith.constant 0 : i32
    return %c0_i32, %c0_i32_0 : i32, i32
  }
  func.func @transform_4(%arg0: i32) -> (i32, i32) {
    %c0_i32 = arith.constant 0 : i32
    %c0_i32_0 = arith.constant 0 : i32
    %c0_i32_1 = arith.constant 0 : i32
    return %c0_i32, %c0_i32_0 : i32, i32
  }
  func.func @transform_5(%arg0: i32) -> (i32, i32) {
    %c0_i32 = arith.constant 0 : i32
    %c0_i32_0 = arith.constant 0 : i32
    %c0_i32_1 = arith.constant 0 : i32
    return %c0_i32, %c0_i32_0 : i32, i32
  }
  func.func @transform_6(%arg0: i32) -> (i32, i32) {
    %c0_i32 = arith.constant 0 : i32
    %c0_i32_0 = arith.constant 0 : i32
    %c0_i32_1 = arith.constant 0 : i32
    return %c0_i32, %c0_i32_0 : i32, i32
  }
  func.func @transform_7(%arg0: i32) -> (i32, i32) {
    %c0_i32 = arith.constant 0 : i32
    %c0_i32_0 = arith.constant 0 : i32
    return %arg0, %c0_i32 : i32, i32
  }
}

</mosaic_0001>

<bundles_post_ra>
// kernel: tpu_custom_call.1
= control target key start
LH: loop header
LB: loop body
LE: loop exit
PB: predicated region body
PF: predicated region fallthrough
CT: control target
= control target key end

     0   :  { %12 = vsyncpa [#allocation3], 0  ;;  %s919_s0 = inlined_call_operand.hbm [shape: bf16[16,128], index: 0, kind: input, shape index: {}]   ;;  %s920_s1 = inlined_call_operand.hbm [shape: bf16[128,128], index: 1, kind: input, shape index: {}]   ;;  %s921_s2 = inlined_call_operand.vmem [shape: f32[2,128], index: 2, kind: input, shape index: {}]   ;;  %s922_s3 = inlined_call_operand.hbm [shape: bf16[128,128], index: 3, kind: input, shape index: {}]   ;;  %s923_s4 = inlined_call_operand.vmem [shape: f32[2,128], index: 4, kind: input, shape index: {}]   ;;  %s924_s5 = inlined_call_operand.hbm [shape: bf16[128,128], index: 5, kind: input, shape index: {}]   ;;  %s925_s6 = inlined_call_operand.vmem [shape: f32[2,128], index: 6, kind: input, shape index: {}]   ;;  %s926_s7 = inlined_call_operand.hbm [shape: f32[16,128], index: 7, kind: output, shape index: {}]  }
   0x1   :  { %13 = vsyncpa [#allocation6], 0 }
   0x2   :  { %14 = vsyncpa [#allocation9], 0 }
   0x3   :  { %15 = vsyncpa [#allocation4], 0  ;;  %s737_s24 = smov [#allocation5]   ;;  %s738_s26 = smov [#allocation2]  }
   0x4   :  { %s33_s25 = sshll.u32 %s737_s24, 4  ;;  %s21_s27 = sshll.u32 %s738_s26, 4  ;;  %s34_s25 = int_to_ptr.vmem [resolvable:$true] %s33_s25  ;;  %s788_s27 = int_to_ptr.vmem [resolvable:$true] %s21_s27 }
   0x5   :  { %s619_s30 = scalar_lea.hbm %s920_s1, 1024 }
   0x6   :  { %p620_p0 = scmp.ne.s32.totalorder %s920_s1, %s619_s30  ;;  %p623_p1 = scmp.lt.u32.totalorder %s619_s30, %s920_s1 }
   0x8   :  { %p625_p2 = pnand %p623_p1, %p620_p0 }
   0xa   :  { %628 = shalt.err (!%p625_p2)
}
   0xb   :  { %s629_s12 = scalar_lea.vmem %s34_s25, 1024  ;;  %p634_p4 = scmp.lt.s32.totalorder %s34_s25, %s34_s25 }
   0xc   :  { %p630_p3 = scmp.ne.s32.totalorder %s34_s25, %s629_s12  ;;  %p635_p5 = scmp.lt.s32.totalorder %s629_s12, %s629_s12 }
   0xe   :  { %p636_p6 = por %p635_p5, %p634_p4 }
  0x10   :  { %p637_p7 = pnand %p636_p6, %p630_p3 }
  0x12   :  { %640 = shalt.err (!%p637_p7)
}
  0x13   :  { %s739_s13 = smov 64   ;;  %s740_s14 = smov 4  }
  0x14   :  { %39 = dma.hbm_to_vmem [thread:$0]  %s920_s1, 1024, %s34_s25, [#allocation6], %s739_s13, %s739_s13, %s740_s14  }
  0x15   :  { %s641_s19 = scalar_lea.hbm %s919_s0, 128 }
  0x16   :  { %p642_p8 = scmp.ne.s32.totalorder %s919_s0, %s641_s19  ;;  %p645_p9 = scmp.lt.u32.totalorder %s641_s19, %s919_s0 }
  0x18   :  { %p647_p10 = pnand %p645_p9, %p642_p8 }
  0x1a   :  { %650 = shalt.err (!%p647_p10)
}
  0x1b   :  { %s651_s24 = scalar_lea.vmem %s788_s27, 128  ;;  %p656_p12 = scmp.lt.s32.totalorder %s788_s27, %s788_s27 }
  0x1c   :  { %p652_p11 = scmp.ne.s32.totalorder %s788_s27, %s651_s24  ;;  %p657_p13 = scmp.lt.s32.totalorder %s651_s24, %s651_s24 }
  0x1e   :  { %p658_p0 = por %p657_p13, %p656_p12 }
  0x20   :  { %p659_p1 = pnand %p658_p0, %p652_p11 }
  0x22   :  { %662 = shalt.err (!%p659_p1)
}
  0x23   :  { %27 = dma.hbm_to_vmem [thread:$0]  %s919_s0, 128, %s788_s27, [#allocation3], %s739_s13, %s739_s13, %s740_s14  }
  0x24   :  { %s741_s26 = smov [#allocation7]   ;;  %s742_s29 = smov [#allocation8]  }
  0x25   :  { %s47_s28 = sshll.u32 %s741_s26, 4  ;;  %s61_s30 = sshll.u32 %s742_s29, 4  ;;  %s48_s28 = int_to_ptr.vmem [resolvable:$true] %s47_s28  ;;  %s825_s30 = int_to_ptr.vmem [resolvable:$true] %s61_s30 }
  0x26   :  { %s663_s10 = scalar_lea.hbm %s922_s3, 1024 }
  0x27   :  { %p664_p2 = scmp.ne.s32.totalorder %s922_s3, %s663_s10  ;;  %p667_p3 = scmp.lt.u32.totalorder %s663_s10, %s922_s3 }
  0x29   :  { %p669_p4 = pnand %p667_p3, %p664_p2 }
  0x2b   :  { %672 = shalt.err (!%p669_p4)
}
  0x2c   :  { %s673_s0 = scalar_lea.vmem %s48_s28, 1024  ;;  %p678_p6 = scmp.lt.s32.totalorder %s48_s28, %s48_s28 }
  0x2d   :  { %p674_p5 = scmp.ne.s32.totalorder %s48_s28, %s673_s0  ;;  %p679_p7 = scmp.lt.s32.totalorder %s673_s0, %s673_s0 }
  0x2f   :  { %p680_p8 = por %p679_p7, %p678_p6 }
  0x31   :  { %p681_p9 = pnand %p680_p8, %p674_p5 }
  0x33   :  { %684 = shalt.err (!%p681_p9)
}
  0x34   :  { %53 = dma.hbm_to_vmem [thread:$0]  %s922_s3, 1024, %s48_s28, [#allocation6], %s739_s13, %s739_s13, %s740_s14  }
  0x35   :  { %s685_s20 = scalar_lea.hbm %s924_s5, 1024 }
  0x36   :  { %p686_p10 = scmp.ne.s32.totalorder %s924_s5, %s685_s20  ;;  %p689_p11 = scmp.lt.u32.totalorder %s685_s20, %s924_s5 }
  0x38   :  { %p691_p12 = pnand %p689_p11, %p686_p10 }
  0x3a   :  { %694 = shalt.err (!%p691_p12)
}
  0x3b   :  { %s695_s1 = scalar_lea.vmem %s825_s30, 1024  ;;  %p700_p0 = scmp.lt.s32.totalorder %s825_s30, %s825_s30 }
  0x3c   :  { %p696_p13 = scmp.ne.s32.totalorder %s825_s30, %s695_s1  ;;  %p701_p1 = scmp.lt.s32.totalorder %s695_s1, %s695_s1 }
  0x3e   :  { %p702_p2 = por %p701_p1, %p700_p0 }
  0x40   :  { %p703_p3 = pnand %p702_p2, %p696_p13 }
  0x42   :  { %706 = shalt.err (!%p703_p3)
}
  0x43   :  { %67 = dma.hbm_to_vmem [thread:$0]  %s924_s5, 1024, %s825_s30, [#allocation9], %s739_s13, %s739_s13, %s740_s14  }
  0x44   :  { %729 = dma.done.wait [#allocation3], 128  }
  0x45   :  { %730 = vsyncadd [#allocation3], 4294967168 }
  0x46   :  { %731 = dma.done.wait [#allocation6], 2048  }
  0x47   :  { %732 = vsyncadd [#allocation6], 4294965248 }
  0x48   :  { %733 = dma.done.wait [#allocation9], 1024  }
  0x49   :  { %734 = vsyncadd [#allocation9], 4294966272  ;;  %v743_v0 = vmov 0.0   ;;  %vm744_vm0 = vmmov 0   ;;  %v594_v1 = vld [vmem:[#allocation5] sm:$0xff]   ;;  %v595_v2 = vld [vmem:[#allocation5 + $0x8] sm:$0xff]  }
  0x4a   :  { %523 = vmatprep.subr.bf16.mxu0 %v743_v0  ;;  %539 = vmatprep.mubr.msk.bf16.mxu0 %vm744_vm0, %v743_v0  ;;  %v596_v3 = vld [vmem:[#allocation5 + $0x10] sm:$0xff]   ;;  %v603_v4 = vld [vmem:[#allocation7] sm:$0xff]   ;;  %v597_v5 = vld [vmem:[#allocation5 + $0x18] sm:$0xff]   ;;  %s745_s10 = smov [#allocation10]  }
  0x4b   :  { %543 = vmatprep.subr.bf16.mxu1 %v743_v0  ;;  %559 = vmatprep.mubr.msk.bf16.mxu1 %vm744_vm0, %v743_v0  ;;  %v604_v6 = vld [vmem:[#allocation7 + $0x8] sm:$0xff]   ;;  %v598_v7 = vld [vmem:[#allocation5 + $0x20] sm:$0xff]   ;;  %v605_v8 = vld [vmem:[#allocation7 + $0x10] sm:$0xff]   ;;  %s452_s11 = sshll.u32 %s745_s10, 4  ;;  %s453_s11 = int_to_ptr.vmem [resolvable:$true] %s452_s11 }
  0x4c   :  { %524 = vmatpush3.bf16.msra.mxu0 %v594_v1  ;;  %544 = vmatpush3.bf16.msra.mxu1 %v603_v4  ;;  %v599_v9 = vld [vmem:[#allocation5 + $0x28] sm:$0xff]   ;;  %v606_v10 = vld [vmem:[#allocation7 + $0x18] sm:$0xff]   ;;  %v600_v11 = vld [vmem:[#allocation5 + $0x30] sm:$0xff]   ;;  %p712_p5 = scmp.lt.s32.totalorder %s453_s11, %s453_s11 }
  0x4d   :  { %525 = vmatprep.subr.bf16.mxu0 %v743_v0  ;;  %545 = vmatprep.subr.bf16.mxu1 %v743_v0  ;;  %v607_v12 = vld [vmem:[#allocation7 + $0x20] sm:$0xff]   ;;  %v601_v13 = vld [vmem:[#allocation5 + $0x38] sm:$0xff]   ;;  %v608_v15 = vld [vmem:[#allocation7 + $0x28] sm:$0xff]  }
  0x4e   :  { %v602_v14 = vld [vmem:[#allocation2] sm:$0xff]   ;;  %v609_v16 = vld [vmem:[#allocation7 + $0x30] sm:$0xff]   ;;  %v611_v18 = vld [vmem:[#allocation8] sm:$0xff]  }
  0x4f   :  { %v610_v17 = vld [vmem:[#allocation7 + $0x38] sm:$0xff]   ;;  %v612_v19 = vld [vmem:[#allocation8 + $0x8] sm:$0xff]   ;;  %v613_v20 = vld [vmem:[#allocation8 + $0x10] sm:$0xff]  }
  0x50   :  { %526 = vmatpush3.bf16.msra.mxu0 %v595_v2  ;;  %546 = vmatpush3.bf16.msra.mxu1 %v604_v6  ;;  %v614_v21 = vld [vmem:[#allocation8 + $0x18] sm:$0xff]   ;;  %v615_v22 = vld [vmem:[#allocation8 + $0x20] sm:$0xff]   ;;  %v616_v36 = vld [vmem:[#allocation8 + $0x28] sm:$0xff]  }
  0x51   :  { %527 = vmatprep.subr.bf16.mxu0 %v743_v0  ;;  %547 = vmatprep.subr.bf16.mxu1 %v743_v0  ;;  %v475_v23 = vld [vmem:[%s921_s2] ss:$0 sm:$0xff]  ;;  %v476_v25 = vld [vmem:[%s921_s2 + $0x1] ss:$0 sm:$0xff]  ;;  %v617_v37 = vld [vmem:[#allocation8 + $0x30] sm:$0xff]  }
  0x52   :  { %v618_v38 = vld [vmem:[#allocation8 + $0x38] sm:$0xff]  }
  0x53   :  { %v485_v39 = vld [vmem:[%s923_s4] ss:$0 sm:$0xff]  ;;  %v486_v41 = vld [vmem:[%s923_s4 + $0x1] ss:$0 sm:$0xff]  ;;  %s707_s4 = scalar_lea.vmem %s453_s11, 256 }
  0x54   :  { %528 = vmatpush3.bf16.msra.mxu0 %v596_v3  ;;  %548 = vmatpush3.bf16.msra.mxu1 %v605_v8  ;;  %v487_v52 = vld [vmem:[%s925_s6 + $0x1] ss:$0 sm:$0xff]  ;;  %p708_p4 = scmp.ne.s32.totalorder %s453_s11, %s707_s4  ;;  %p713_p6 = scmp.lt.s32.totalorder %s707_s4, %s707_s4 }
  0x55   :  { %529 = vmatprep.subr.bf16.mxu0 %v743_v0  ;;  %549 = vmatprep.subr.bf16.mxu1 %v743_v0 }
  0x56   :  { %p714_p7 = por %p713_p6, %p712_p5 }
  0x58   :  { %530 = vmatpush3.bf16.msra.mxu0 %v597_v5  ;;  %550 = vmatpush3.bf16.msra.mxu1 %v606_v10  ;;  %p715_p8 = pnand %p714_p7, %p708_p4 }
  0x59   :  { %531 = vmatprep.subr.bf16.mxu0 %v743_v0  ;;  %551 = vmatprep.subr.bf16.mxu1 %v743_v0 }
  0x5c   :  { %532 = vmatpush3.bf16.msra.mxu0 %v598_v7  ;;  %552 = vmatpush3.bf16.msra.mxu1 %v607_v12 }
  0x5d   :  { %533 = vmatprep.subr.bf16.mxu0 %v743_v0  ;;  %553 = vmatprep.subr.bf16.mxu1 %v743_v0 }
  0x60   :  { %534 = vmatpush3.bf16.msra.mxu0 %v599_v9  ;;  %554 = vmatpush3.bf16.msra.mxu1 %v608_v15 }
  0x61   :  { %535 = vmatprep.subr.bf16.mxu0 %v743_v0  ;;  %555 = vmatprep.subr.bf16.mxu1 %v743_v0 }
  0x64   :  { %536 = vmatpush3.bf16.msra.mxu0 %v600_v11  ;;  %556 = vmatpush3.bf16.msra.mxu1 %v609_v16 }
  0x65   :  { %537 = vmatprep.subr.bf16.mxu0 %v743_v0  ;;  %557 = vmatprep.subr.bf16.mxu1 %v743_v0 }
  0x68   :  { %538 = vmatpush3.bf16.msra.mxu0 %v601_v13  ;;  %558 = vmatpush3.bf16.msra.mxu1 %v610_v17 }
  0x69   :  { %563 = vmatprep.subr.bf16.mxu0 %v743_v0 }
  0x6b   :  { %540 = vmatmul.mubr.bf16.vlgmr.msra.gmra.mrb[0].mxu0 %v602_v14 }
  0x6c   :  { %579 = vmatprep.mubr.msk.bf16.mxu0 %vm744_vm0, %v743_v0  ;;  %564 = vmatpush3.bf16.msra.mxu0 %v611_v18 }
  0x6d   :  { %565 = vmatprep.subr.bf16.mxu0 %v743_v0 }
  0x70   :  { %566 = vmatpush3.bf16.msra.mxu0 %v612_v19 }
  0x71   :  { %567 = vmatprep.subr.bf16.mxu0 %v743_v0 }
  0x74   :  { %568 = vmatpush3.bf16.msra.mxu0 %v613_v20 }
  0x75   :  { %569 = vmatprep.subr.bf16.mxu0 %v743_v0 }
  0x78   :  { %570 = vmatpush3.bf16.msra.mxu0 %v614_v21 }
  0x79   :  { %571 = vmatprep.subr.bf16.mxu0 %v743_v0 }
  0x7c   :  { %572 = vmatpush3.bf16.msra.mxu0 %v615_v22 }
  0x7d   :  { %573 = vmatprep.subr.bf16.mxu0 %v743_v0 }
  0x80   :  { %574 = vmatpush3.bf16.msra.mxu0 %v616_v36 }
  0x81   :  { %575 = vmatprep.subr.bf16.mxu0 %v743_v0 }
  0x84   :  { %576 = vmatpush3.bf16.msra.mxu0 %v617_v37 }
  0x85   :  { %577 = vmatprep.subr.bf16.mxu0 %v743_v0 }
  0x88   :  { %578 = vmatpush3.bf16.msra.mxu0 %v618_v38 }
 0x13e   :  { %v189_v24 = vpop.f32.mrb[0].mxu0 }
 0x13f   :  { %v201_v26 = vmul.f32 %v475_v23, %v189_v24  ;;  %v541_v27 = vpop.f32.mrb[1].mxu0 }
 0x140   :  { %v192_v28 = vpop.f32.mrb[2].mxu0 }
 0x141   :  { %v208_v29 = vadd.f32 %v476_v25, %v201_v26  ;;  %v202_v30 = vmul.f32 %v475_v23, %v192_v28  ;;  %v542_v31 = vpop.f32.mrb[3].mxu0 }
 0x143   :  { %v209_v32 = vadd.f32 %v476_v25, %v202_v30  ;;  %v210_v33 = vmax.f32 %v208_v29, 0.0 }
 0x145   :  { %v211_v34 = vmax.f32 %v209_v32, 0.0 }
 0x147   :  { %v212_v35 = vpack.c.bf16 %v211_v34, %v210_v33 }
 0x149   :  { %560 = vmatmul.mubr.bf16.vlgmr.msra.gmra.mrb[0].mxu1 %v212_v35 }
 0x21c   :  { %v311_v40 = vpop.f32.mrb[0].mxu1 }
 0x21d   :  { %v323_v42 = vmul.f32 %v485_v39, %v311_v40  ;;  %v561_v43 = vpop.f32.mrb[1].mxu1 }
 0x21e   :  { %v314_v44 = vpop.f32.mrb[2].mxu1 }
 0x21f   :  { %v330_v45 = vadd.f32 %v486_v41, %v323_v42  ;;  %v324_v46 = vmul.f32 %v485_v39, %v314_v44  ;;  %v562_v47 = vpop.f32.mrb[3].mxu1 }
 0x221   :  { %v331_v48 = vadd.f32 %v486_v41, %v324_v46  ;;  %v332_v49 = vmax.f32 %v330_v45, 0.0 }
 0x223   :  { %v333_v50 = vmax.f32 %v331_v48, 0.0 }
 0x225   :  { %v334_v51 = vpack.c.bf16 %v333_v50, %v332_v49 }
 0x227   :  { %580 = vmatmul.mubr.bf16.vlgmr.msra.gmra.mrb[4].mxu0 %v334_v51 }
 0x2fa   :  { %v438_v53 = vpop.f32.mrb[4].mxu0 }
 0x2fb   :  { %v439_v54 = vadd.f32 %v487_v52, %v438_v53  ;;  %v581_v55 = vpop.f32.mrb[5].mxu0 }
 0x2fc   :  { %v441_v56 = vpop.f32.mrb[6].mxu0 }
 0x2fd   :  { %445 = vst [vmem:[#allocation10] sm:$0xff] %v439_v54  ;;  %v442_v57 = vadd.f32 %v487_v52, %v441_v56  ;;  %v582_v58 = vpop.f32.mrb[7].mxu0 }
 0x2ff   :  { %446 = vst [vmem:[#allocation10 + $0x8] sm:$0xff] %v442_v57 }
 0x300   :  { %718 = shalt.err (!%p715_p8)
}
 0x301   :  { %s719_s15 = scalar_lea.hbm %s926_s7, 256 }
 0x302   :  { %p720_p9 = scmp.ne.s32.totalorder %s926_s7, %s719_s15  ;;  %p723_p10 = scmp.lt.u32.totalorder %s719_s15, %s926_s7 }
 0x304   :  { %p725_p11 = pnand %p723_p10, %p720_p9 }
 0x306   :  { %728 = shalt.err (!%p725_p11)
}
 0x307   :  { %s746_s18 = smov 128   ;;  %s747_s19 = smov 8  }
 0x308   :  { %458 = dma.vmem_to_hbm [thread:$0]  %s453_s11, 256, %s926_s7, [#allocation4], %s746_s18, %s746_s18, %s747_s19  }
 0x309   :  { %735 = dma.done.wait [#allocation4], 256  }
 0x30a   :  { %736 = vsyncadd [#allocation4], 4294967040 }
 0x30b   :  { %462 = vsyncpa [#allocation3], 1 }
 0x30c   :  { %463 = vsyncpa [#allocation6], 1 }
 0x30d   :  { %464 = vsyncpa [#allocation9], 1 }
 0x30e   :  { %465 = vsyncpa [#allocation4], 1 }

// kernel: tpu_custom_call.1
= control target key start
LH: loop header
LB: loop body
LE: loop exit
PB: predicated region body
PF: predicated region fallthrough
CT: control target
= control target key end

     0   :  { %12 = vsyncpa [#allocation3], 0  ;;  %s919_s0 = inlined_call_operand.hbm [shape: bf16[16,128], index: 0, kind: input, shape index: {}]   ;;  %s920_s1 = inlined_call_operand.hbm [shape: bf16[128,128], index: 1, kind: input, shape index: {}]   ;;  %s921_s2 = inlined_call_operand.vmem [shape: f32[2,128], index: 2, kind: input, shape index: {}]   ;;  %s922_s3 = inlined_call_operand.hbm [shape: bf16[128,128], index: 3, kind: input, shape index: {}]   ;;  %s923_s4 = inlined_call_operand.vmem [shape: f32[2,128], index: 4, kind: input, shape index: {}]   ;;  %s924_s5 = inlined_call_operand.hbm [shape: bf16[128,128], index: 5, kind: input, shape index: {}]   ;;  %s925_s6 = inlined_call_operand.vmem [shape: f32[2,128], index: 6, kind: input, shape index: {}]   ;;  %s926_s7 = inlined_call_operand.hbm [shape: f32[16,128], index: 7, kind: output, shape index: {}]  }
   0x1   :  { %13 = vsyncpa [#allocation6], 0 }
   0x2   :  { %14 = vsyncpa [#allocation9], 0 }
   0x3   :  { %15 = vsyncpa [#allocation4], 0  ;;  %s737_s24 = smov [#allocation5]   ;;  %s738_s26 = smov [#allocation2]  }
   0x4   :  { %s33_s25 = sshll.u32 %s737_s24, 4  ;;  %s21_s27 = sshll.u32 %s738_s26, 4  ;;  %s34_s25 = int_to_ptr.vmem [resolvable:$true] %s33_s25  ;;  %s788_s27 = int_to_ptr.vmem [resolvable:$true] %s21_s27 }
   0x5   :  { %s619_s30 = scalar_lea.hbm %s920_s1, 1024 }
   0x6   :  { %p620_p0 = scmp.ne.s32.totalorder %s920_s1, %s619_s30  ;;  %p623_p1 = scmp.lt.u32.totalorder %s619_s30, %s920_s1 }
   0x8   :  { %p625_p2 = pnand %p623_p1, %p620_p0 }
   0xa   :  { %628 = shalt.err (!%p625_p2)
}
   0xb   :  { %s629_s12 = scalar_lea.vmem %s34_s25, 1024  ;;  %p634_p4 = scmp.lt.s32.totalorder %s34_s25, %s34_s25 }
   0xc   :  { %p630_p3 = scmp.ne.s32.totalorder %s34_s25, %s629_s12  ;;  %p635_p5 = scmp.lt.s32.totalorder %s629_s12, %s629_s12 }
   0xe   :  { %p636_p6 = por %p635_p5, %p634_p4 }
  0x10   :  { %p637_p7 = pnand %p636_p6, %p630_p3 }
  0x12   :  { %640 = shalt.err (!%p637_p7)
}
  0x13   :  { %s739_s13 = smov 64   ;;  %s740_s14 = smov 4  }
  0x14   :  { %39 = dma.hbm_to_vmem [thread:$0]  %s920_s1, 1024, %s34_s25, [#allocation6], %s739_s13, %s739_s13, %s740_s14  }
  0x15   :  { %s641_s19 = scalar_lea.hbm %s919_s0, 128 }
  0x16   :  { %p642_p8 = scmp.ne.s32.totalorder %s919_s0, %s641_s19  ;;  %p645_p9 = scmp.lt.u32.totalorder %s641_s19, %s919_s0 }
  0x18   :  { %p647_p10 = pnand %p645_p9, %p642_p8 }
  0x1a   :  { %650 = shalt.err (!%p647_p10)
}
  0x1b   :  { %s651_s24 = scalar_lea.vmem %s788_s27, 128  ;;  %p656_p12 = scmp.lt.s32.totalorder %s788_s27, %s788_s27 }
  0x1c   :  { %p652_p11 = scmp.ne.s32.totalorder %s788_s27, %s651_s24  ;;  %p657_p13 = scmp.lt.s32.totalorder %s651_s24, %s651_s24 }
  0x1e   :  { %p658_p0 = por %p657_p13, %p656_p12 }
  0x20   :  { %p659_p1 = pnand %p658_p0, %p652_p11 }
  0x22   :  { %662 = shalt.err (!%p659_p1)
}
  0x23   :  { %27 = dma.hbm_to_vmem [thread:$0]  %s919_s0, 128, %s788_s27, [#allocation3], %s739_s13, %s739_s13, %s740_s14  }
  0x24   :  { %s741_s26 = smov [#allocation7]   ;;  %s742_s29 = smov [#allocation8]  }
  0x25   :  { %s47_s28 = sshll.u32 %s741_s26, 4  ;;  %s61_s30 = sshll.u32 %s742_s29, 4  ;;  %s48_s28 = int_to_ptr.vmem [resolvable:$true] %s47_s28  ;;  %s825_s30 = int_to_ptr.vmem [resolvable:$true] %s61_s30 }
  0x26   :  { %s663_s10 = scalar_lea.hbm %s922_s3, 1024 }
  0x27   :  { %p664_p2 = scmp.ne.s32.totalorder %s922_s3, %s663_s10  ;;  %p667_p3 = scmp.lt.u32.totalorder %s663_s10, %s922_s3 }
  0x29   :  { %p669_p4 = pnand %p667_p3, %p664_p2 }
  0x2b   :  { %672 = shalt.err (!%p669_p4)
}
  0x2c   :  { %s673_s0 = scalar_lea.vmem %s48_s28, 1024  ;;  %p678_p6 = scmp.lt.s32.totalorder %s48_s28, %s48_s28 }
  0x2d   :  { %p674_p5 = scmp.ne.s32.totalorder %s48_s28, %s673_s0  ;;  %p679_p7 = scmp.lt.s32.totalorder %s673_s0, %s673_s0 }
  0x2f   :  { %p680_p8 = por %p679_p7, %p678_p6 }
  0x31   :  { %p681_p9 = pnand %p680_p8, %p674_p5 }
  0x33   :  { %684 = shalt.err (!%p681_p9)
}
  0x34   :  { %53 = dma.hbm_to_vmem [thread:$0]  %s922_s3, 1024, %s48_s28, [#allocation6], %s739_s13, %s739_s13, %s740_s14  }
  0x35   :  { %s685_s20 = scalar_lea.hbm %s924_s5, 1024 }
  0x36   :  { %p686_p10 = scmp.ne.s32.totalorder %s924_s5, %s685_s20  ;;  %p689_p11 = scmp.lt.u32.totalorder %s685_s20, %s924_s5 }
  0x38   :  { %p691_p12 = pnand %p689_p11, %p686_p10 }
  0x3a   :  { %694 = shalt.err (!%p691_p12)
}
  0x3b   :  { %s695_s1 = scalar_lea.vmem %s825_s30, 1024  ;;  %p700_p0 = scmp.lt.s32.totalorder %s825_s30, %s825_s30 }
  0x3c   :  { %p696_p13 = scmp.ne.s32.totalorder %s825_s30, %s695_s1  ;;  %p701_p1 = scmp.lt.s32.totalorder %s695_s1, %s695_s1 }
  0x3e   :  { %p702_p2 = por %p701_p1, %p700_p0 }
  0x40   :  { %p703_p3 = pnand %p702_p2, %p696_p13 }
  0x42   :  { %706 = shalt.err (!%p703_p3)
}
  0x43   :  { %67 = dma.hbm_to_vmem [thread:$0]  %s924_s5, 1024, %s825_s30, [#allocation9], %s739_s13, %s739_s13, %s740_s14  }
  0x44   :  { %729 = dma.done.wait [#allocation3], 128  }
  0x45   :  { %730 = vsyncadd [#allocation3], 4294967168 }
  0x46   :  { %731 = dma.done.wait [#allocation6], 2048  }
  0x47   :  { %732 = vsyncadd [#allocation6], 4294965248 }
  0x48   :  { %733 = dma.done.wait [#allocation9], 1024  }
  0x49   :  { %734 = vsyncadd [#allocation9], 4294966272  ;;  %v743_v0 = vmov 0.0   ;;  %vm744_vm0 = vmmov 0   ;;  %v594_v1 = vld [vmem:[#allocation5] sm:$0xff]   ;;  %v595_v2 = vld [vmem:[#allocation5 + $0x8] sm:$0xff]  }
  0x4a   :  { %523 = vmatprep.subr.bf16.mxu0 %v743_v0  ;;  %539 = vmatprep.mubr.msk.bf16.mxu0 %vm744_vm0, %v743_v0  ;;  %v596_v3 = vld [vmem:[#allocation5 + $0x10] sm:$0xff]   ;;  %v603_v4 = vld [vmem:[#allocation7] sm:$0xff]   ;;  %v597_v5 = vld [vmem:[#allocation5 + $0x18] sm:$0xff]   ;;  %s745_s10 = smov [#allocation10]  }
  0x4b   :  { %543 = vmatprep.subr.bf16.mxu1 %v743_v0  ;;  %559 = vmatprep.mubr.msk.bf16.mxu1 %vm744_vm0, %v743_v0  ;;  %v604_v6 = vld [vmem:[#allocation7 + $0x8] sm:$0xff]   ;;  %v598_v7 = vld [vmem:[#allocation5 + $0x20] sm:$0xff]   ;;  %v605_v8 = vld [vmem:[#allocation7 + $0x10] sm:$0xff]   ;;  %s452_s11 = sshll.u32 %s745_s10, 4  ;;  %s453_s11 = int_to_ptr.vmem [resolvable:$true] %s452_s11 }
  0x4c   :  { %524 = vmatpush3.bf16.msra.mxu0 %v594_v1  ;;  %544 = vmatpush3.bf16.msra.mxu1 %v603_v4  ;;  %v599_v9 = vld [vmem:[#allocation5 + $0x28] sm:$0xff]   ;;  %v606_v10 = vld [vmem:[#allocation7 + $0x18] sm:$0xff]   ;;  %v600_v11 = vld [vmem:[#allocation5 + $0x30] sm:$0xff]   ;;  %p712_p5 = scmp.lt.s32.totalorder %s453_s11, %s453_s11 }
  0x4d   :  { %525 = vmatprep.subr.bf16.mxu0 %v743_v0  ;;  %545 = vmatprep.subr.bf16.mxu1 %v743_v0  ;;  %v607_v12 = vld [vmem:[#allocation7 + $0x20] sm:$0xff]   ;;  %v601_v13 = vld [vmem:[#allocation5 + $0x38] sm:$0xff]   ;;  %v608_v15 = vld [vmem:[#allocation7 + $0x28] sm:$0xff]  }
  0x4e   :  { %v602_v14 = vld [vmem:[#allocation2] sm:$0xff]   ;;  %v609_v16 = vld [vmem:[#allocation7 + $0x30] sm:$0xff]   ;;  %v611_v18 = vld [vmem:[#allocation8] sm:$0xff]  }
  0x4f   :  { %v610_v17 = vld [vmem:[#allocation7 + $0x38] sm:$0xff]   ;;  %v612_v19 = vld [vmem:[#allocation8 + $0x8] sm:$0xff]   ;;  %v613_v20 = vld [vmem:[#allocation8 + $0x10] sm:$0xff]  }
  0x50   :  { %526 = vmatpush3.bf16.msra.mxu0 %v595_v2  ;;  %546 = vmatpush3.bf16.msra.mxu1 %v604_v6  ;;  %v614_v21 = vld [vmem:[#allocation8 + $0x18] sm:$0xff]   ;;  %v615_v22 = vld [vmem:[#allocation8 + $0x20] sm:$0xff]   ;;  %v616_v36 = vld [vmem:[#allocation8 + $0x28] sm:$0xff]  }
  0x51   :  { %527 = vmatprep.subr.bf16.mxu0 %v743_v0  ;;  %547 = vmatprep.subr.bf16.mxu1 %v743_v0  ;;  %v475_v23 = vld [vmem:[%s921_s2] ss:$0 sm:$0xff]  ;;  %v476_v25 = vld [vmem:[%s921_s2 + $0x1] ss:$0 sm:$0xff]  ;;  %v617_v37 = vld [vmem:[#allocation8 + $0x30] sm:$0xff]  }
  0x52   :  { %v618_v38 = vld [vmem:[#allocation8 + $0x38] sm:$0xff]  }
  0x53   :  { %v485_v39 = vld [vmem:[%s923_s4] ss:$0 sm:$0xff]  ;;  %v486_v41 = vld [vmem:[%s923_s4 + $0x1] ss:$0 sm:$0xff]  ;;  %s707_s4 = scalar_lea.vmem %s453_s11, 256 }
  0x54   :  { %528 = vmatpush3.bf16.msra.mxu0 %v596_v3  ;;  %548 = vmatpush3.bf16.msra.mxu1 %v605_v8  ;;  %v487_v52 = vld [vmem:[%s925_s6 + $0x1] ss:$0 sm:$0xff]  ;;  %p708_p4 = scmp.ne.s32.totalorder %s453_s11, %s707_s4  ;;  %p713_p6 = scmp.lt.s32.totalorder %s707_s4, %s707_s4 }
  0x55   :  { %529 = vmatprep.subr.bf16.mxu0 %v743_v0  ;;  %549 = vmatprep.subr.bf16.mxu1 %v743_v0 }
  0x56   :  { %p714_p7 = por %p713_p6, %p712_p5 }
  0x58   :  { %530 = vmatpush3.bf16.msra.mxu0 %v597_v5  ;;  %550 = vmatpush3.bf16.msra.mxu1 %v606_v10  ;;  %p715_p8 = pnand %p714_p7, %p708_p4 }
  0x59   :  { %531 = vmatprep.subr.bf16.mxu0 %v743_v0  ;;  %551 = vmatprep.subr.bf16.mxu1 %v743_v0 }
  0x5c   :  { %532 = vmatpush3.bf16.msra.mxu0 %v598_v7  ;;  %552 = vmatpush3.bf16.msra.mxu1 %v607_v12 }
  0x5d   :  { %533 = vmatprep.subr.bf16.mxu0 %v743_v0  ;;  %553 = vmatprep.subr.bf16.mxu1 %v743_v0 }
  0x60   :  { %534 = vmatpush3.bf16.msra.mxu0 %v599_v9  ;;  %554 = vmatpush3.bf16.msra.mxu1 %v608_v15 }
  0x61   :  { %535 = vmatprep.subr.bf16.mxu0 %v743_v0  ;;  %555 = vmatprep.subr.bf16.mxu1 %v743_v0 }
  0x64   :  { %536 = vmatpush3.bf16.msra.mxu0 %v600_v11  ;;  %556 = vmatpush3.bf16.msra.mxu1 %v609_v16 }
  0x65   :  { %537 = vmatprep.subr.bf16.mxu0 %v743_v0  ;;  %557 = vmatprep.subr.bf16.mxu1 %v743_v0 }
  0x68   :  { %538 = vmatpush3.bf16.msra.mxu0 %v601_v13  ;;  %558 = vmatpush3.bf16.msra.mxu1 %v610_v17 }
  0x69   :  { %563 = vmatprep.subr.bf16.mxu0 %v743_v0 }
  0x6b   :  { %540 = vmatmul.mubr.bf16.vlgmr.msra.gmra.mrb[0].mxu0 %v602_v14 }
  0x6c   :  { %579 = vmatprep.mubr.msk.bf16.mxu0 %vm744_vm0, %v743_v0  ;;  %564 = vmatpush3.bf16.msra.mxu0 %v611_v18 }
  0x6d   :  { %565 = vmatprep.subr.bf16.mxu0 %v743_v0 }
  0x70   :  { %566 = vmatpush3.bf16.msra.mxu0 %v612_v19 }
  0x71   :  { %567 = vmatprep.subr.bf16.mxu0 %v743_v0 }
  0x74   :  { %568 = vmatpush3.bf16.msra.mxu0 %v613_v20 }
  0x75   :  { %569 = vmatprep.subr.bf16.mxu0 %v743_v0 }
  0x78   :  { %570 = vmatpush3.bf16.msra.mxu0 %v614_v21 }
  0x79   :  { %571 = vmatprep.subr.bf16.mxu0 %v743_v0 }
  0x7c   :  { %572 = vmatpush3.bf16.msra.mxu0 %v615_v22 }
  0x7d   :  { %573 = vmatprep.subr.bf16.mxu0 %v743_v0 }
  0x80   :  { %574 = vmatpush3.bf16.msra.mxu0 %v616_v36 }
  0x81   :  { %575 = vmatprep.subr.bf16.mxu0 %v743_v0 }
  0x84   :  { %576 = vmatpush3.bf16.msra.mxu0 %v617_v37 }
  0x85   :  { %577 = vmatprep.subr.bf16.mxu0 %v743_v0 }
  0x88   :  { %578 = vmatpush3.bf16.msra.mxu0 %v618_v38 }
 0x13e   :  { %v189_v24 = vpop.f32.mrb[0].mxu0 }
 0x13f   :  { %v201_v26 = vmul.f32 %v475_v23, %v189_v24  ;;  %v541_v27 = vpop.f32.mrb[1].mxu0 }
 0x140   :  { %v192_v28 = vpop.f32.mrb[2].mxu0 }
 0x141   :  { %v208_v29 = vadd.f32 %v476_v25, %v201_v26  ;;  %v202_v30 = vmul.f32 %v475_v23, %v192_v28  ;;  %v542_v31 = vpop.f32.mrb[3].mxu0 }
 0x143   :  { %v209_v32 = vadd.f32 %v476_v25, %v202_v30  ;;  %v210_v33 = vmax.f32 %v208_v29, 0.0 }
 0x145   :  { %v211_v34 = vmax.f32 %v209_v32, 0.0 }
 0x147   :  { %v212_v35 = vpack.c.bf16 %v211_v34, %v210_v33 }
 0x149   :  { %560 = vmatmul.mubr.bf16.vlgmr.msra.gmra.mrb[0].mxu1 %v212_v35 }
 0x21c   :  { %v311_v40 = vpop.f32.mrb[0].mxu1 }
 0x21d   :  { %v323_v42 = vmul.f32 %v485_v39, %v311_v40  ;;  %v561_v43 = vpop.f32.mrb[1].mxu1 }
 0x21e   :  { %v314_v44 = vpop.f32.mrb[2].mxu1 }
 0x21f   :  { %v330_v45 = vadd.f32 %v486_v41, %v323_v42  ;;  %v324_v46 = vmul.f32 %v485_v39, %v314_v44  ;;  %v562_v47 = vpop.f32.mrb[3].mxu1 }
 0x221   :  { %v331_v48 = vadd.f32 %v486_v41, %v324_v46  ;;  %v332_v49 = vmax.f32 %v330_v45, 0.0 }
 0x223   :  { %v333_v50 = vmax.f32 %v331_v48, 0.0 }
 0x225   :  { %v334_v51 = vpack.c.bf16 %v333_v50, %v332_v49 }
 0x227   :  { %580 = vmatmul.mubr.bf16.vlgmr.msra.gmra.mrb[4].mxu0 %v334_v51 }
 0x2fa   :  { %v438_v53 = vpop.f32.mrb[4].mxu0 }
 0x2fb   :  { %v439_v54 = vadd.f32 %v487_v52, %v438_v53  ;;  %v581_v55 = vpop.f32.mrb[5].mxu0 }
 0x2fc   :  { %v441_v56 = vpop.f32.mrb[6].mxu0 }
 0x2fd   :  { %445 = vst [vmem:[#allocation10] sm:$0xff] %v439_v54  ;;  %v442_v57 = vadd.f32 %v487_v52, %v441_v56  ;;  %v582_v58 = vpop.f32.mrb[7].mxu0 }
 0x2ff   :  { %446 = vst [vmem:[#allocation10 + $0x8] sm:$0xff] %v442_v57 }
 0x300   :  { %718 = shalt.err (!%p715_p8)
}
 0x301   :  { %s719_s15 = scalar_lea.hbm %s926_s7, 256 }
 0x302   :  { %p720_p9 = scmp.ne.s32.totalorder %s926_s7, %s719_s15  ;;  %p723_p10 = scmp.lt.u32.totalorder %s719_s15, %s926_s7 }
 0x304   :  { %p725_p11 = pnand %p723_p10, %p720_p9 }
 0x306   :  { %728 = shalt.err (!%p725_p11)
}
 0x307   :  { %s746_s18 = smov 128   ;;  %s747_s19 = smov 8  }
 0x308   :  { %458 = dma.vmem_to_hbm [thread:$0]  %s453_s11, 256, %s926_s7, [#allocation4], %s746_s18, %s746_s18, %s747_s19  }
 0x309   :  { %735 = dma.done.wait [#allocation4], 256  }
 0x30a   :  { %736 = vsyncadd [#allocation4], 4294967040 }
 0x30b   :  { %462 = vsyncpa [#allocation3], 1 }
 0x30c   :  { %463 = vsyncpa [#allocation6], 1 }
 0x30d   :  { %464 = vsyncpa [#allocation9], 1 }
 0x30e   :  { %465 = vsyncpa [#allocation4], 1 }

</bundles_post_ra>
